<compile_context>
chip_gen: v7x
topology: tpu7x:2x2x1
jax: 0.10.0
libtpu: 0.0.40
codegen_flags: <defaults>
</compile_context>

<pallas_src>
import jax
import jax.numpy as jnp
from jax.experimental import pallas as pl
from jax.experimental.pallas import tpu as pltpu

_DEFAULT_AXIS_Z = jnp.array([0.0, 0.0, 1.0], dtype=jnp.float32)


def _round_up(x, m):
    return ((x + m - 1) // m) * m


def _rotate_flat_kernel(coeff_ref, coords_ref, out_ref):
    """Single-spatial-tile path: one grid step == TB batch elements, full grid.

    coeff_ref  : (TB, nd*nd)    coeff[b, i*nd + j] = R[b, j, i]
    coords_ref : (nd, HW)       flattened, lane-padded grid coordinates
    out_ref    : (TB, nd*HW)    rotated coords, row i stored at lanes [i*HW, (i+1)*HW)
    """
    nd, hw = coords_ref.shape
    cs = [coords_ref[j : j + 1, :] for j in range(nd)]            # each (1, HW)
    for i in range(nd):                                           # nd in (2, 3): unrolled
        acc = coeff_ref[:, i * nd : i * nd + 1] * cs[0]           # (TB,1)*(1,HW)->(TB,HW)
        for j in range(1, nd):
            acc = acc + coeff_ref[:, i * nd + j : i * nd + j + 1] * cs[j]
        out_ref[:, i * hw : (i + 1) * hw] = acc                   # dense, unmasked store


def _rotate_tiled_kernel(coeff_ref, coords_ref, out_ref):
    """Fallback for very large grids: (TB batch elems) x (one spatial lane tile).

    coeff_ref  : (TB, nd*nd)
    coords_ref : (nd, THW)
    out_ref    : (TB, nd, THW)
    """
    nd = coords_ref.shape[0]
    cs = [coords_ref[j : j + 1, :] for j in range(nd)]
    for i in range(nd):
        acc = coeff_ref[:, i * nd : i * nd + 1] * cs[0]
        for j in range(1, nd):
            acc = acc + coeff_ref[:, i * nd + j : i * nd + j + 1] * cs[j]
        out_ref[:, i, :] = acc


def _pose_to_coeffs(pose, nd):
    """(B, 4) axis-angle pose -> (B, nd*nd) coefficients, coeff[b, i*nd+j] = R[b, j, i].

    Mirrors torch: F.normalize's max(||v||, 1e-12) and the nested stack(axis=-1)
    in quaternion_to_rotation_matrix, which stores M[i, j] = R[j, i].
    """
    theta = pose[:, 0:1]
    axis = pose[:, 1:4]
    norm = jnp.sqrt(jnp.sum(axis * axis, axis=1, keepdims=True))
    axis = axis / jnp.maximum(norm, 1e-12)

    half = 0.5 * theta[:, 0]
    q0 = jnp.cos(half)
    s = jnp.sin(half)
    q1 = axis[:, 0] * s
    q2 = axis[:, 1] * s
    q3 = axis[:, 2] * s

    R00 = q0 * q0 + q1 * q1 - q2 * q2 - q3 * q3
    R01 = 2.0 * (q1 * q2 - q0 * q3)
    R02 = 2.0 * (q1 * q3 + q0 * q2)
    R10 = 2.0 * (q1 * q2 + q0 * q3)
    R11 = q0 * q0 - q1 * q1 + q2 * q2 - q3 * q3
    R12 = 2.0 * (q2 * q3 - q0 * q1)
    R20 = 2.0 * (q1 * q3 - q0 * q2)
    R21 = 2.0 * (q2 * q3 + q0 * q1)
    R22 = q0 * q0 - q1 * q1 - q2 * q2 + q3 * q3

    # Nested stack(axis=-1): M[b, i, j] = R[b, j, i]  (same quirk as the torch code)
    M = jnp.stack(
        [
            jnp.stack([R00, R01, R02], axis=-1),
            jnp.stack([R10, R11, R12], axis=-1),
            jnp.stack([R20, R21, R22], axis=-1),
        ],
        axis=-1,
    )
    return M[:, :nd, :nd].reshape(pose.shape[0], nd * nd).astype(jnp.float32)


class RotatedCoordinates:
    """JAX/Pallas port of the PyTorch RotatedCoordinates module."""

    _LANE_TILE_CAP = 16384               # max spatial lanes per grid step
    _OUT_BLOCK_BYTES = 4 * 1024 * 1024   # per-buffer output block budget

    def __init__(self, shape, *, default_axis=_DEFAULT_AXIS_Z):
        if len(shape) not in (2, 3):
            raise ValueError("Only 2D or 3D rotations are currently supported")
        lins = [jnp.linspace(-1.0, 1.0, sz, dtype=jnp.float32) for sz in shape]
        grids = list(jnp.meshgrid(*lins, indexing="xy"))
        if len(shape) == 2:
            grids.append(jnp.zeros_like(grids[0]))
        # (3, hw): homogeneous flattened grid (kept for parity with the torch module)
        self.coords = jnp.stack([jnp.ravel(g) for g in grids], axis=0)
        self._shape = tuple(shape)
        self._ndim = len(shape)
        self._default_axis = default_axis

        hw = self.coords.shape[1]
        self._hw = hw
        thw = min(_round_up(hw, 128), self._LANE_TILE_CAP)
        hw_pad = _round_up(hw, thw)
        self._thw = thw
        self._hw_pad = hw_pad
        # Only the ndim coordinate rows that contribute (the z row is all zeros in 2D).
        coords_used = self.coords[: self._ndim, :]
        self._coords_pad = jnp.pad(coords_used, ((0, 0), (0, hw_pad - hw)))

    # -- batch tiling shared by both paths ------------------------------------
    def _batch_tiling(self, batch, row_bytes):
        b8 = _round_up(batch, 8)
        tb_cap = max(8, (self._OUT_BLOCK_BYTES // row_bytes) // 8 * 8)
        tb = min(b8, tb_cap)
        if b8 >= 16:  # keep >= 2 grid steps when the batch allows it (megacore)
            tb = min(tb, _round_up((b8 + 1) // 2, 8))
        b_pad = _round_up(b8, tb)
        return tb, b_pad

    def __call__(self, pose):
        batch = pose.shape[0]
        if pose.shape[-1] == 1:
            pose = jnp.concatenate(
                [pose, jnp.tile(self._default_axis[None, :], (batch, 1))], axis=-1
            )
        assert pose.shape[-1] == 4, pose.shape
        pose = pose.astype(jnp.float32)

        nd = self._ndim
        coeff = _pose_to_coeffs(pose, nd)                 # (B, nd*nd), O(B) work hoisted
        thw, hw_pad = self._thw, self._hw_pad

        if hw_pad == thw:
            # ---- fast path: whole spatial grid in one lane tile, flat lane-dense output
            row_bytes = nd * hw_pad * 4
            tb, b_pad = self._batch_tiling(batch, row_bytes)
            coeff = jnp.pad(coeff, ((0, b_pad - batch), (0, 0)))
            grid = (b_pad // tb,)

            rotated = pl.pallas_call(
                _rotate_flat_kernel,
                out_shape=jax.ShapeDtypeStruct((b_pad, nd * hw_pad), jnp.float32),
                grid_spec=pltpu.PrefetchScalarGridSpec(
                    num_scalar_prefetch=0,
                    grid=grid,
                    in_specs=[
                        pl.BlockSpec((tb, nd * nd), lambda g: (g, 0)),
                        pl.BlockSpec((nd, hw_pad), lambda g: (0, 0)),
                    ],
                    out_specs=pl.BlockSpec((tb, nd * hw_pad), lambda g: (g, 0)),
                ),
                compiler_params=pltpu.CompilerParams(
                    dimension_semantics=("parallel",),
                ),
            )(coeff, self._coords_pad)

            rotated = rotated[:batch].reshape(batch, nd, hw_pad)[:, :, : self._hw]
            return rotated.reshape((batch, nd) + self._shape)

        # ---- fallback: very large grids -> tile the spatial axis as well
        # (the (nd, THW) output plane pads nd -> 8 sublanes in VMEM, so budget with 8)
        row_bytes = 8 * thw * 4
        tb, b_pad = self._batch_tiling(batch, row_bytes)
        coeff = jnp.pad(coeff, ((0, b_pad - batch), (0, 0)))
        grid = (b_pad // tb, hw_pad // thw)

        rotated = pl.pallas_call(
            _rotate_tiled_kernel,
            out_shape=jax.ShapeDtypeStruct((b_pad, nd, hw_pad), jnp.float32),
            grid_spec=pltpu.PrefetchScalarGridSpec(
                num_scalar_prefetch=0,
                grid=grid,
                in_specs=[
                    pl.BlockSpec((tb, nd * nd), lambda g, h: (g, 0)),
                    pl.BlockSpec((nd, thw), lambda g, h: (0, h)),
                ],
                out_specs=pl.BlockSpec((tb, nd, thw), lambda g, h: (g, 0, h)),
            ),
            compiler_params=pltpu.CompilerParams(
                dimension_semantics=("parallel", "parallel"),
            ),
        )(coeff, self._coords_pad)

        rotated = rotated[:batch, :, : self._hw]
        return rotated.reshape((batch, nd) + self._shape)


def _reference(pose, coords, shape, default_axis=_DEFAULT_AXIS_Z):
    """Pure-JAX reference mirroring the torch module (incl. the M = R^T quirk)."""
    n = pose.shape[0]
    if pose.shape[-1] == 1:
        pose = jnp.concatenate([pose, jnp.tile(default_axis[None, :], (n, 1))], -1)
    theta = pose[:, 0:1]
    axis = pose[:, 1:]
    axis = axis / jnp.maximum(
        jnp.sqrt(jnp.sum(axis * axis, axis=1, keepdims=True)), 1e-12
    )
    q0 = jnp.cos(theta / 2)[:, 0]
    s = jnp.sin(theta / 2)[:, 0]
    q1, q2, q3 = axis[:, 0] * s, axis[:, 1] * s, axis[:, 2] * s
    R00 = q0**2 + q1**2 - q2**2 - q3**2
    R01 = 2 * (q1 * q2 - q0 * q3)
    R02 = 2 * (q1 * q3 + q0 * q2)
    R10 = 2 * (q1 * q2 + q0 * q3)
    R11 = q0**2 - q1**2 + q2**2 - q3**2
    R12 = 2 * (q2 * q3 - q0 * q1)
    R20 = 2 * (q1 * q3 - q0 * q2)
    R21 = 2 * (q2 * q3 + q0 * q1)
    R22 = q0**2 - q1**2 - q2**2 + q3**2
    # nested stack(axis=-1): M[n, i, j] = R[j, i]
    M = jnp.stack(
        [
            jnp.stack([R00, R01, R02], axis=-1),
            jnp.stack([R10, R11, R12], axis=-1),
            jnp.stack([R20, R21, R22], axis=-1),
        ],
        axis=-1,
    )
    out = jnp.einsum("nij,jp->nip", M, coords)
    ndim = len(shape)
    return out[:, :ndim, :].reshape((n, ndim) + tuple(shape))


if __name__ == "__main__":
    key = jax.random.PRNGKey(0)
    k1, k2, k3, k4 = jax.random.split(key, 4)

    # ---- Case 1/2: 2D 16x16 grid (flat fast path), full pose and angle-only pose.
    shape2d = (16, 16)
    batch = 2
    module2d = RotatedCoordinates(shape2d)

    pose4 = jax.random.normal(k1, (batch, 4), dtype=jnp.float32)
    out4 = jax.block_until_ready(module2d(pose4))
    ref4 = _reference(pose4, module2d.coords, shape2d)
    assert out4.shape == (batch, 2, 16, 16), out4.shape
    assert jnp.allclose(out4, ref4, atol=1e-5, rtol=1e-5)

    pose1 = jax.random.uniform(k2, (batch, 1), dtype=jnp.float32, minval=-3.0, maxval=3.0)
    out1 = jax.block_until_ready(module2d(pose1))
    ref1 = _reference(pose1, module2d.coords, shape2d)
    assert out1.shape == (batch, 2, 16, 16), out1.shape
    assert jnp.allclose(out1, ref1, atol=1e-5, rtol=1e-5)

    # ---- Case 3: small 3D grid (nd = 3, flat fast path).
    shape3d = (8, 8, 8)
    module3d = RotatedCoordinates(shape3d)
    pose3d = jax.random.normal(k3, (batch, 4), dtype=jnp.float32)
    out3d = jax.block_until_ready(module3d(pose3d))
    ref3d = _reference(pose3d, module3d.coords, shape3d)
    assert out3d.shape == (batch, 3, 8, 8, 8), out3d.shape
    assert jnp.allclose(out3d, ref3d, atol=1e-5, rtol=1e-5)

    # ---- Case 4: large 2D grid exceeding one lane tile (exercises the tiled fallback).
    shape_big = (256, 128)
    module_big = RotatedCoordinates(shape_big)
    pose_big = jax.random.normal(k4, (batch, 4), dtype=jnp.float32)
    out_big = jax.block_until_ready(module_big(pose_big))
    ref_big = _reference(pose_big, module_big.coords, shape_big)
    assert out_big.shape == (batch, 2, 256, 128), out_big.shape
    assert jnp.allclose(out_big, ref_big, atol=1e-5, rtol=1e-5)

    print("KERNEL_OK")
</pallas_src>

<mosaic_0001>
module attributes {stable_mosaic.version = 11 : i64} {
  func.func @_rotate_flat_kernel(%arg0: i32, %arg1: memref<8x4xf32, #tpu.memory_space<vmem>>, %arg2: memref<2x256xf32, #tpu.memory_space<vmem>>, %arg3: memref<8x512xf32, #tpu.memory_space<vmem>>) attributes {dimension_semantics = [#tpu.dimension_semantics<parallel>], iteration_bounds = array<i64: 1>, scalar_prefetch = 0 : i64, scratch_operands = 0 : i64, tpu.core_type = #tpu.core_type<tc>, window_params = [{transform_indices = @transform_0, window_bounds = array<i64: 8, 4>}, {pipeline_mode = #tpu.pipeline_mode<synchronous>, transform_indices = @transform_1, window_bounds = array<i64: 2, 256>}, {transform_indices = @transform_2, window_bounds = array<i64: 8, 512>}]} {
    %c0 = arith.constant 0 : index
    %c0_0 = arith.constant 0 : index
    %0 = vector.load %arg2[%c0, %c0_0] : memref<2x256xf32, #tpu.memory_space<vmem>>, vector<1x256xf32>
    %c1 = arith.constant 1 : index
    %c0_1 = arith.constant 0 : index
    %1 = vector.load %arg2[%c1, %c0_1] : memref<2x256xf32, #tpu.memory_space<vmem>>, vector<1x256xf32>
    %c0_2 = arith.constant 0 : index
    %c0_3 = arith.constant 0 : index
    %2 = vector.load %arg1[%c0_2, %c0_3] : memref<8x4xf32, #tpu.memory_space<vmem>>, vector<8x1xf32>
    %3 = vector.broadcast %2 : vector<8x1xf32> to vector<8x256xf32>
    %4 = vector.broadcast %0 : vector<1x256xf32> to vector<8x256xf32>
    %5 = arith.mulf %3, %4 : vector<8x256xf32>
    %c0_4 = arith.constant 0 : index
    %c1_5 = arith.constant 1 : index
    %6 = vector.load %arg1[%c0_4, %c1_5] : memref<8x4xf32, #tpu.memory_space<vmem>>, vector<8x1xf32>
    %7 = vector.broadcast %6 : vector<8x1xf32> to vector<8x256xf32>
    %8 = vector.broadcast %1 : vector<1x256xf32> to vector<8x256xf32>
    %9 = arith.mulf %7, %8 : vector<8x256xf32>
    %10 = arith.addf %5, %9 : vector<8x256xf32>
    %c0_6 = arith.constant 0 : index
    %c0_7 = arith.constant 0 : index
    %11 = vector.load %arg3[%c0_6, %c0_7] : memref<8x512xf32, #tpu.memory_space<vmem>>, vector<8x256xf32>
    tpu.vector_store %arg3[%c0_6, %c0_7], %10 {strides = array<i32>} : memref<8x512xf32, #tpu.memory_space<vmem>>, vector<8x256xf32>,
    %c0_8 = arith.constant 0 : index
    %c2 = arith.constant 2 : index
    %12 = vector.load %arg1[%c0_8, %c2] : memref<8x4xf32, #tpu.memory_space<vmem>>, vector<8x1xf32>
    %13 = vector.broadcast %12 : vector<8x1xf32> to vector<8x256xf32>
    %14 = vector.broadcast %0 : vector<1x256xf32> to vector<8x256xf32>
    %15 = arith.mulf %13, %14 : vector<8x256xf32>
    %c0_9 = arith.constant 0 : index
    %c3 = arith.constant 3 : index
    %16 = vector.load %arg1[%c0_9, %c3] : memref<8x4xf32, #tpu.memory_space<vmem>>, vector<8x1xf32>
    %17 = vector.broadcast %16 : vector<8x1xf32> to vector<8x256xf32>
    %18 = vector.broadcast %1 : vector<1x256xf32> to vector<8x256xf32>
    %19 = arith.mulf %17, %18 : vector<8x256xf32>
    %20 = arith.addf %15, %19 : vector<8x256xf32>
    %c0_10 = arith.constant 0 : index
    %c256 = arith.constant 256 : index
    %21 = vector.load %arg3[%c0_10, %c256] : memref<8x512xf32, #tpu.memory_space<vmem>>, vector<8x256xf32>
    tpu.vector_store %arg3[%c0_10, %c256], %20 {strides = array<i32>} : memref<8x512xf32, #tpu.memory_space<vmem>>, vector<8x256xf32>,
    return
  }
  func.func @transform_0(%arg0: i32) -> (i32, i32) {
    %c0_i32 = arith.constant 0 : i32
    %c0_i32_0 = arith.constant 0 : i32
    return %arg0, %c0_i32 : i32, i32
  }
  func.func @transform_1(%arg0: i32) -> (i32, i32) {
    %c0_i32 = arith.constant 0 : i32
    %c0_i32_0 = arith.constant 0 : i32
    %c0_i32_1 = arith.constant 0 : i32
    return %c0_i32, %c0_i32_0 : i32, i32
  }
  func.func @transform_2(%arg0: i32) -> (i32, i32) {
    %c0_i32 = arith.constant 0 : i32
    %c0_i32_0 = arith.constant 0 : i32
    return %arg0, %c0_i32 : i32, i32
  }
}

</mosaic_0001>

<bundles_post_ra>
// kernel: tpu_custom_call.1
= control target key start
LH: loop header
LB: loop body
LE: loop exit
PB: predicated region body
PF: predicated region fallthrough
CT: control target
= control target key end

     0   :  { %v122_v1 = vmov 2   ;;  %v123_v2 = vmov 0   ;;  %s163_s0 = inlined_call_operand.vmem [shape: f32[8,4], index: 0, kind: input, shape index: {}]   ;;  %s164_s1 = inlined_call_operand.vmem [shape: f32[2,256], index: 1, kind: input, shape index: {}]   ;;  %s165_s2 = inlined_call_operand.hbm [shape: f32[8,512], index: 2, kind: output, shape index: {}]  }
   0x1   :  { %v55_v0 = vld [vmem:[%s163_s0] sm:$0xff]  ;;  %95 = vset.pattern.permute.xlu1 %v122_v1  ;;  %93 = vset.pattern.permute.xlu0 %v123_v2 }
   0x2   :  { %7 = vsyncpa [#allocation3], 0  ;;  %58 = vperm.xlu1 %95, %v55_v0   ;;  %18 = vperm.xlu0 %93, %v55_v0   ;;  %v124_v3 = vmov 3   ;;  %v125_v4 = vmov 1   ;;  %v22_v5 = vlaneseq  ;;  %s126_s14 = smov [#allocation2]  }
   0x3   :  { %v12_v9 = vld [vmem:[%s164_s1] ss:$2 sm:$0x3]  ;;  %v87_v10 = vld [vmem:[%s164_s1 + $0x1] ss:$2 sm:$0x3] }
   0x4   :  { %v23_v6 = vshrl.u32 %v22_v5, 7  ;;  %s79_s15 = sshll.u32 %s126_s14, 4  ;;  %s80_s15 = int_to_ptr.vmem [resolvable:$true] %s79_s15 }
   0x5   :  { %s98_s1 = scalar_lea.vmem %s80_s15, 512  ;;  %p103_p1 = scmp.lt.s32.totalorder %s80_s15, %s80_s15 }
   0x6   :  { %96 = vset.pattern.permute.xlu1 %v124_v3  ;;  %94 = vset.pattern.permute.xlu0 %v125_v4  ;;  %v24_v7 = vsub.s32 0, %v23_v6  ;;  %v28_v8 = vsub.s32 1, %v23_v6  ;;  %p99_p0 = scmp.ne.s32.totalorder %s80_s15, %s98_s1  ;;  %p104_p2 = scmp.lt.s32.totalorder %s98_s1, %s98_s1 }
   0x7   :  { %64 = vperm.xlu1 %96, %v55_v0   ;;  %35 = vperm.xlu0 %94, %v55_v0  }
   0x8   :  { %v25_v13 = vrot.slane %v12_v9, %v24_v7  ;;  %v29_v14 = vrot.slane %v12_v9, %v28_v8  ;;  %v42_v15 = vrot.slane %v87_v10, %v24_v7  ;;  %v46_v16 = vrot.slane %v87_v10, %v28_v8  ;;  %p105_p3 = por %p104_p2, %p103_p1 }
   0xa   :  { %p106_p4 = pnand %p105_p3, %p99_p0 }
   0xb   :  { %97 = vset.pattern.permute.xlu0 %v124_v3 }
  0x81   :  { %v59_v11 = vpop.permute.xlu1 %58  ;;  %v19_v12 = vpop.permute.xlu0 %18 }
  0x82   :  { %v61_v17 = vmul.f32 %v59_v11, %v25_v13  ;;  %v62_v18 = vmul.f32 %v59_v11, %v29_v14  ;;  %v32_v19 = vmul.f32 %v25_v13, %v19_v12  ;;  %v33_v20 = vmul.f32 %v29_v14, %v19_v12 }
  0x86   :  { %v65_v21 = vpop.permute.xlu1 %64  ;;  %v36_v22 = vpop.permute.xlu0 %35 }
  0x87   :  { %v67_v23 = vmul.f32 %v65_v21, %v42_v15  ;;  %v68_v24 = vmul.f32 %v65_v21, %v46_v16  ;;  %v49_v25 = vmul.f32 %v42_v15, %v36_v22  ;;  %v50_v26 = vmul.f32 %v46_v16, %v36_v22 }
  0x89   :  { %v69_v27 = vadd.f32 %v67_v23, %v61_v17  ;;  %v70_v28 = vadd.f32 %v68_v24, %v62_v18  ;;  %v51_v29 = vadd.f32 %v49_v25, %v32_v19  ;;  %v52_v30 = vadd.f32 %v50_v26, %v33_v20 }
  0x8b   :  { %71 = vst [vmem:[#allocation2 + $0x10] sm:$0xff] %v69_v27  ;;  %72 = vst [vmem:[#allocation2 + $0x18] sm:$0xff] %v70_v28 }
  0x8c   :  { %53 = vst [vmem:[#allocation2] sm:$0xff] %v51_v29  ;;  %54 = vst [vmem:[#allocation2 + $0x8] sm:$0xff] %v52_v30 }
  0x8d   :  { %109 = shalt.err (!%p106_p4)
}
  0x8e   :  { %s110_s18 = scalar_lea.hbm %s165_s2, 512 }
  0x8f   :  { %p111_p5 = scmp.ne.s32.totalorder %s165_s2, %s110_s18  ;;  %p114_p6 = scmp.lt.u32.totalorder %s110_s18, %s165_s2 }
  0x91   :  { %p116_p7 = pnand %p114_p6, %p111_p5 }
  0x93   :  { %119 = shalt.err (!%p116_p7)
}
  0x94   :  { %82 = dma.vmem_to_hbm [thread:$0]  %s80_s15, 512, %s165_s2, [#allocation3]  }
  0x95   :  { %120 = dma.done.wait [#allocation3], 512  }
  0x96   :  { %121 = vsyncadd [#allocation3], 4294966784 }
  0x97   :  { %86 = vsyncpa [#allocation3], 1 }

</bundles_post_ra>
